<compile_context>
chip_gen: v7x
topology: tpu7x:2x2x1
jax: 0.10.0
libtpu: 0.0.40
codegen_flags: <defaults>
</compile_context>

<pallas_src>
import functools

import jax
import jax.numpy as jnp
from jax import lax
from jax.experimental import pallas as pl
from jax.experimental.pallas import tpu as pltpu


# ----------------------------------------------------------------------------
# Fused kernel: one image, whole WavBlock
# ----------------------------------------------------------------------------
def _wavblock_kernel(x_ref, wb_ref, scale_ref, bias_ref, out_ref,
                     buf0, buf1, *, H, WC, n_layers):
    """x_ref    : (1, H, WC)        input image, WC = W*C (lane-dense)
       wb_ref   : (L, 3, WC, WC)    banded conv weights, one (WC,WC) per (layer, dy)
       scale_ref: (L, 1, WC)        folded BN scale, tiled along W
       bias_ref : (L, 1, WC)        folded BN bias,  tiled along W
       out_ref  : (1, H, WC)
       buf0/buf1: (H+2, WC) f32     VMEM ping-pong activation buffers (row halo)
    """
    bufs = (buf0, buf1)
    buf0[...] = jnp.zeros_like(buf0)   # zero halos once; interiors rewritten
    buf1[...] = jnp.zeros_like(buf1)

    x = x_ref[0].astype(jnp.float32)                 # (H, WC)
    buf0[pl.ds(1, H), :] = x

    h = x
    for l in range(n_layers):
        src = bufs[l % 2]
        acc = jnp.zeros((H, WC), jnp.float32)
        for dy in range(3):                          # 3 sublane-shifted matmuls
            acc += jnp.dot(src[pl.ds(dy, H), :], wb_ref[l, dy],
                           preferred_element_type=jnp.float32)
        h = jnp.maximum(acc * scale_ref[l] + bias_ref[l], 0.0)   # BN + ReLU
        if l + 1 < n_layers:
            bufs[(l + 1) % 2][pl.ds(1, H), :] = h

    out_ref[0] = jnp.maximum(x + h, 0.0).astype(out_ref.dtype)   # residual + ReLU


# ----------------------------------------------------------------------------
# Host-side parameter preprocessing + wrapper
# ----------------------------------------------------------------------------
def _banded_conv_weight(w_hwio, W):
    """(3,3,Cin,Cout) HWIO -> (3, W*Cin, W*Cout) banded matrices B[dy] such that
    out2d[h, w*Cout+co] = sum_dy xrow[h-1+dy, :] @ B[dy].  Zero-padding along W
    is expressed by simply omitting out-of-range taps."""
    kH, kW, Cin, Cout = w_hwio.shape
    assert (kH, kW) == (3, 3)
    B = jnp.zeros((kH, W * Cin, W * Cout), w_hwio.dtype)
    for w in range(W):
        for dx in range(kW):
            s = w + dx - 1                           # source column (pad = 1)
            if 0 <= s < W:
                B = B.at[:, s * Cin:(s + 1) * Cin,
                         w * Cout:(w + 1) * Cout].set(w_hwio[:, dx])
    return B


def wavblock_forward(x, params):
    """out = relu(x + CBR3(CBR2(CBR1(x)))).  x: (N, H, W, C) NHWC."""
    N, H, W, C = x.shape
    WC = W * C
    L = len(params)

    wb = jnp.stack([_banded_conv_weight(w, W) for (w, _, _) in params])  # (L,3,WC,WC)
    scale = jnp.stack([jnp.tile(s.reshape(-1), W)[None, :] for (_, s, _) in params])
    bias = jnp.stack([jnp.tile(b.reshape(-1), W)[None, :] for (_, _, b) in params])

    x2 = x.reshape(N, H, WC)          # lane-dense HBM layout (contiguous merge)

    out2 = pl.pallas_call(
        functools.partial(_wavblock_kernel, H=H, WC=WC, n_layers=L),
        out_shape=jax.ShapeDtypeStruct((N, H, WC), x.dtype),
        grid=(N,),
        in_specs=[
            pl.BlockSpec((1, H, WC), lambda n: (n, 0, 0)),
            pl.BlockSpec((L, 3, WC, WC), lambda n: (0, 0, 0, 0)),
            pl.BlockSpec((L, 1, WC), lambda n: (0, 0, 0)),
            pl.BlockSpec((L, 1, WC), lambda n: (0, 0, 0)),
        ],
        out_specs=pl.BlockSpec((1, H, WC), lambda n: (n, 0, 0)),
        scratch_shapes=[pltpu.VMEM((H + 2, WC), jnp.float32),
                        pltpu.VMEM((H + 2, WC), jnp.float32)],
        compiler_params=pltpu.CompilerParams(dimension_semantics=("parallel",)),
    )(x2, wb, scale, bias)
    return out2.reshape(N, H, W, C)


# ----------------------------------------------------------------------------
# Deterministic parameter setup + pure-JAX reference
# ----------------------------------------------------------------------------
def make_params(key, channels, n_layers=3, eps=1e-5):
    params = []
    for i in range(n_layers):
        k = jax.random.fold_in(key, i)
        kw, kg, kb, km, kv = jax.random.split(k, 5)
        w = jax.random.normal(kw, (3, 3, channels, channels), jnp.float32) * 0.1
        gamma = 1.0 + 0.1 * jax.random.normal(kg, (channels,), jnp.float32)
        beta = 0.1 * jax.random.normal(kb, (channels,), jnp.float32)
        mean = 0.1 * jax.random.normal(km, (channels,), jnp.float32)
        var = jnp.abs(jax.random.normal(kv, (channels,), jnp.float32)) + 1.0
        scale = gamma / jnp.sqrt(var + eps)
        bias = beta - mean * scale
        params.append((w, scale.reshape(1, channels), bias.reshape(1, channels)))
    return params


def wavblock_reference(x, params):
    h = x
    for (w, scale, bias) in params:
        h = lax.conv_general_dilated(
            h, w, window_strides=(1, 1), padding=[(1, 1), (1, 1)],
            dimension_numbers=("NHWC", "HWIO", "NHWC"))
        h = jnp.maximum(h * scale[0] + bias[0], 0.0)
    return jnp.maximum(x + h, 0.0)


# ----------------------------------------------------------------------------
if __name__ == "__main__":
    key = jax.random.PRNGKey(0)
    N, C, H, W = 2, 4, 16, 16          # torch input would be (N, C, H, W)
    kx, kp = jax.random.split(key)
    x = jax.random.normal(kx, (N, H, W, C), jnp.float32)  # NHWC layout
    params = make_params(kp, C)

    out = wavblock_forward(x, params)
    out = jax.block_until_ready(out)

    ref = wavblock_reference(x, params)
    assert out.shape == (N, H, W, C)
    err = jnp.max(jnp.abs(out - ref))
    assert jnp.allclose(out, ref, atol=2e-4, rtol=2e-4), f"max abs err {err}"

    print("KERNEL_OK")
</pallas_src>

<mosaic_0001>
module attributes {stable_mosaic.version = 11 : i64} {
  func.func @_wavblock_kernel(%arg0: i32, %arg1: memref<1x16x64xf32, #tpu.memory_space<vmem>>, %arg2: memref<3x3x64x64xf32, #tpu.memory_space<vmem>>, %arg3: memref<3x1x64xf32, #tpu.memory_space<vmem>>, %arg4: memref<3x1x64xf32, #tpu.memory_space<vmem>>, %arg5: memref<1x16x64xf32, #tpu.memory_space<vmem>>, %arg6: memref<18x64xf32, #tpu.memory_space<vmem>>, %arg7: memref<18x64xf32, #tpu.memory_space<vmem>>) attributes {dimension_semantics = [#tpu.dimension_semantics<parallel>], iteration_bounds = array<i64: 2>, scalar_prefetch = 0 : i64, scratch_operands = 2 : i64, tpu.core_type = #tpu.core_type<tc>, window_params = [{transform_indices = @transform_0, window_bounds = array<i64: 1, 16, 64>}, {pipeline_mode = #tpu.pipeline_mode<synchronous>, transform_indices = @transform_1, window_bounds = array<i64: 3, 3, 64, 64>}, {pipeline_mode = #tpu.pipeline_mode<synchronous>, transform_indices = @transform_2, window_bounds = array<i64: 3, 1, 64>}, {pipeline_mode = #tpu.pipeline_mode<synchronous>, transform_indices = @transform_3, window_bounds = array<i64: 3, 1, 64>}, {transform_indices = @transform_4, window_bounds = array<i64: 1, 16, 64>}]} {
    %cst = arith.constant 0.000000e+00 : f32
    %0 = vector.broadcast %cst : f32 to vector<18x64xf32>
    %c0 = arith.constant 0 : index
    %c0_0 = arith.constant 0 : index
    %1 = vector.load %arg6[%c0, %c0_0] : memref<18x64xf32, #tpu.memory_space<vmem>>, vector<18x64xf32>
    tpu.vector_store %arg6[%c0, %c0_0], %0 {strides = array<i32>} : memref<18x64xf32, #tpu.memory_space<vmem>>, vector<18x64xf32>,
    %cst_1 = arith.constant 0.000000e+00 : f32
    %2 = vector.broadcast %cst_1 : f32 to vector<18x64xf32>
    %c0_2 = arith.constant 0 : index
    %c0_3 = arith.constant 0 : index
    %3 = vector.load %arg7[%c0_2, %c0_3] : memref<18x64xf32, #tpu.memory_space<vmem>>, vector<18x64xf32>
    tpu.vector_store %arg7[%c0_2, %c0_3], %2 {strides = array<i32>} : memref<18x64xf32, #tpu.memory_space<vmem>>, vector<18x64xf32>,
    %c0_4 = arith.constant 0 : index
    %c0_5 = arith.constant 0 : index
    %c0_6 = arith.constant 0 : index
    %4 = vector.load %arg1[%c0_4, %c0_5, %c0_6] : memref<1x16x64xf32, #tpu.memory_space<vmem>>, vector<1x16x64xf32>
    %5 = vector.shape_cast %4 : vector<1x16x64xf32> to vector<16x64xf32>
    %c1 = arith.constant 1 : index
    %c0_7 = arith.constant 0 : index
    %6 = vector.load %arg6[%c1, %c0_7] : memref<18x64xf32, #tpu.memory_space<vmem>>, vector<16x64xf32>
    tpu.vector_store %arg6[%c1, %c0_7], %5 {strides = array<i32>} : memref<18x64xf32, #tpu.memory_space<vmem>>, vector<16x64xf32>,
    %cst_8 = arith.constant 0.000000e+00 : f32
    %7 = vector.broadcast %cst_8 : f32 to vector<16x64xf32>
    %c0_9 = arith.constant 0 : index
    %c0_10 = arith.constant 0 : index
    %8 = vector.load %arg6[%c0_9, %c0_10] : memref<18x64xf32, #tpu.memory_space<vmem>>, vector<16x64xf32>
    %c0_11 = arith.constant 0 : index
    %c0_12 = arith.constant 0 : index
    %c0_13 = arith.constant 0 : index
    %c0_14 = arith.constant 0 : index
    %9 = vector.load %arg2[%c0_11, %c0_12, %c0_13, %c0_14] : memref<3x3x64x64xf32, #tpu.memory_space<vmem>>, vector<1x1x64x64xf32>
    %10 = vector.shape_cast %9 : vector<1x1x64x64xf32> to vector<64x64xf32>
    %cst_15 = arith.constant dense<0.000000e+00> : vector<16x64xf32>
    %11 = tpu.matmul %8, %10, %cst_15 {dimension_numbers = #tpu.dot_dimension_numbers<[1], [0], [0], [1], [0, 0, 1, 1], [], []>} : vector<16x64xf32>, vector<64x64xf32>, vector<16x64xf32> -> vector<16x64xf32>
    %12 = arith.addf %7, %11 : vector<16x64xf32>
    %c1_16 = arith.constant 1 : index
    %c0_17 = arith.constant 0 : index
    %13 = vector.load %arg6[%c1_16, %c0_17] : memref<18x64xf32, #tpu.memory_space<vmem>>, vector<16x64xf32>
    %c0_18 = arith.constant 0 : index
    %c1_19 = arith.constant 1 : index
    %c0_20 = arith.constant 0 : index
    %c0_21 = arith.constant 0 : index
    %14 = vector.load %arg2[%c0_18, %c1_19, %c0_20, %c0_21] : memref<3x3x64x64xf32, #tpu.memory_space<vmem>>, vector<1x1x64x64xf32>
    %15 = vector.shape_cast %14 : vector<1x1x64x64xf32> to vector<64x64xf32>
    %cst_22 = arith.constant dense<0.000000e+00> : vector<16x64xf32>
    %16 = tpu.matmul %13, %15, %cst_22 {dimension_numbers = #tpu.dot_dimension_numbers<[1], [0], [0], [1], [0, 0, 1, 1], [], []>} : vector<16x64xf32>, vector<64x64xf32>, vector<16x64xf32> -> vector<16x64xf32>
    %17 = arith.addf %12, %16 : vector<16x64xf32>
    %c2 = arith.constant 2 : index
    %c0_23 = arith.constant 0 : index
    %18 = vector.load %arg6[%c2, %c0_23] : memref<18x64xf32, #tpu.memory_space<vmem>>, vector<16x64xf32>
    %c0_24 = arith.constant 0 : index
    %c2_25 = arith.constant 2 : index
    %c0_26 = arith.constant 0 : index
    %c0_27 = arith.constant 0 : index
    %19 = vector.load %arg2[%c0_24, %c2_25, %c0_26, %c0_27] : memref<3x3x64x64xf32, #tpu.memory_space<vmem>>, vector<1x1x64x64xf32>
    %20 = vector.shape_cast %19 : vector<1x1x64x64xf32> to vector<64x64xf32>
    %cst_28 = arith.constant dense<0.000000e+00> : vector<16x64xf32>
    %21 = tpu.matmul %18, %20, %cst_28 {dimension_numbers = #tpu.dot_dimension_numbers<[1], [0], [0], [1], [0, 0, 1, 1], [], []>} : vector<16x64xf32>, vector<64x64xf32>, vector<16x64xf32> -> vector<16x64xf32>
    %22 = arith.addf %17, %21 : vector<16x64xf32>
    %c0_29 = arith.constant 0 : index
    %c0_30 = arith.constant 0 : index
    %c0_31 = arith.constant 0 : index
    %23 = vector.load %arg3[%c0_29, %c0_30, %c0_31] : memref<3x1x64xf32, #tpu.memory_space<vmem>>, vector<1x1x64xf32>
    %24 = vector.shape_cast %23 : vector<1x1x64xf32> to vector<1x64xf32>
    %25 = vector.broadcast %24 : vector<1x64xf32> to vector<16x64xf32>
    %26 = arith.mulf %22, %25 : vector<16x64xf32>
    %c0_32 = arith.constant 0 : index
    %c0_33 = arith.constant 0 : index
    %c0_34 = arith.constant 0 : index
    %27 = vector.load %arg4[%c0_32, %c0_33, %c0_34] : memref<3x1x64xf32, #tpu.memory_space<vmem>>, vector<1x1x64xf32>
    %28 = vector.shape_cast %27 : vector<1x1x64xf32> to vector<1x64xf32>
    %29 = vector.broadcast %28 : vector<1x64xf32> to vector<16x64xf32>
    %30 = arith.addf %26, %29 : vector<16x64xf32>
    %cst_35 = arith.constant 0.000000e+00 : f32
    %31 = vector.broadcast %cst_35 : f32 to vector<16x64xf32>
    %32 = arith.maximumf %30, %31 : vector<16x64xf32>
    %c1_36 = arith.constant 1 : index
    %c0_37 = arith.constant 0 : index
    %33 = vector.load %arg7[%c1_36, %c0_37] : memref<18x64xf32, #tpu.memory_space<vmem>>, vector<16x64xf32>
    tpu.vector_store %arg7[%c1_36, %c0_37], %32 {strides = array<i32>} : memref<18x64xf32, #tpu.memory_space<vmem>>, vector<16x64xf32>,
    %cst_38 = arith.constant 0.000000e+00 : f32
    %34 = vector.broadcast %cst_38 : f32 to vector<16x64xf32>
    %c0_39 = arith.constant 0 : index
    %c0_40 = arith.constant 0 : index
    %35 = vector.load %arg7[%c0_39, %c0_40] : memref<18x64xf32, #tpu.memory_space<vmem>>, vector<16x64xf32>
    %c1_41 = arith.constant 1 : index
    %c0_42 = arith.constant 0 : index
    %c0_43 = arith.constant 0 : index
    %c0_44 = arith.constant 0 : index
    %36 = vector.load %arg2[%c1_41, %c0_42, %c0_43, %c0_44] : memref<3x3x64x64xf32, #tpu.memory_space<vmem>>, vector<1x1x64x64xf32>
    %37 = vector.shape_cast %36 : vector<1x1x64x64xf32> to vector<64x64xf32>
    %cst_45 = arith.constant dense<0.000000e+00> : vector<16x64xf32>
    %38 = tpu.matmul %35, %37, %cst_45 {dimension_numbers = #tpu.dot_dimension_numbers<[1], [0], [0], [1], [0, 0, 1, 1], [], []>} : vector<16x64xf32>, vector<64x64xf32>, vector<16x64xf32> -> vector<16x64xf32>
    %39 = arith.addf %34, %38 : vector<16x64xf32>
    %c1_46 = arith.constant 1 : index
    %c0_47 = arith.constant 0 : index
    %40 = vector.load %arg7[%c1_46, %c0_47] : memref<18x64xf32, #tpu.memory_space<vmem>>, vector<16x64xf32>
    %c1_48 = arith.constant 1 : index
    %c1_49 = arith.constant 1 : index
    %c0_50 = arith.constant 0 : index
    %c0_51 = arith.constant 0 : index
    %41 = vector.load %arg2[%c1_48, %c1_49, %c0_50, %c0_51] : memref<3x3x64x64xf32, #tpu.memory_space<vmem>>, vector<1x1x64x64xf32>
    %42 = vector.shape_cast %41 : vector<1x1x64x64xf32> to vector<64x64xf32>
    %cst_52 = arith.constant dense<0.000000e+00> : vector<16x64xf32>
    %43 = tpu.matmul %40, %42, %cst_52 {dimension_numbers = #tpu.dot_dimension_numbers<[1], [0], [0], [1], [0, 0, 1, 1], [], []>} : vector<16x64xf32>, vector<64x64xf32>, vector<16x64xf32> -> vector<16x64xf32>
    %44 = arith.addf %39, %43 : vector<16x64xf32>
    %c2_53 = arith.constant 2 : index
    %c0_54 = arith.constant 0 : index
    %45 = vector.load %arg7[%c2_53, %c0_54] : memref<18x64xf32, #tpu.memory_space<vmem>>, vector<16x64xf32>
    %c1_55 = arith.constant 1 : index
    %c2_56 = arith.constant 2 : index
    %c0_57 = arith.constant 0 : index
    %c0_58 = arith.constant 0 : index
    %46 = vector.load %arg2[%c1_55, %c2_56, %c0_57, %c0_58] : memref<3x3x64x64xf32, #tpu.memory_space<vmem>>, vector<1x1x64x64xf32>
    %47 = vector.shape_cast %46 : vector<1x1x64x64xf32> to vector<64x64xf32>
    %cst_59 = arith.constant dense<0.000000e+00> : vector<16x64xf32>
    %48 = tpu.matmul %45, %47, %cst_59 {dimension_numbers = #tpu.dot_dimension_numbers<[1], [0], [0], [1], [0, 0, 1, 1], [], []>} : vector<16x64xf32>, vector<64x64xf32>, vector<16x64xf32> -> vector<16x64xf32>
    %49 = arith.addf %44, %48 : vector<16x64xf32>
    %c1_60 = arith.constant 1 : index
    %c0_61 = arith.constant 0 : index
    %c0_62 = arith.constant 0 : index
    %50 = vector.load %arg3[%c1_60, %c0_61, %c0_62] : memref<3x1x64xf32, #tpu.memory_space<vmem>>, vector<1x1x64xf32>
    %51 = vector.shape_cast %50 : vector<1x1x64xf32> to vector<1x64xf32>
    %52 = vector.broadcast %51 : vector<1x64xf32> to vector<16x64xf32>
    %53 = arith.mulf %49, %52 : vector<16x64xf32>
    %c1_63 = arith.constant 1 : index
    %c0_64 = arith.constant 0 : index
    %c0_65 = arith.constant 0 : index
    %54 = vector.load %arg4[%c1_63, %c0_64, %c0_65] : memref<3x1x64xf32, #tpu.memory_space<vmem>>, vector<1x1x64xf32>
    %55 = vector.shape_cast %54 : vector<1x1x64xf32> to vector<1x64xf32>
    %56 = vector.broadcast %55 : vector<1x64xf32> to vector<16x64xf32>
    %57 = arith.addf %53, %56 : vector<16x64xf32>
    %cst_66 = arith.constant 0.000000e+00 : f32
    %58 = vector.broadcast %cst_66 : f32 to vector<16x64xf32>
    %59 = arith.maximumf %57, %58 : vector<16x64xf32>
    %c1_67 = arith.constant 1 : index
    %c0_68 = arith.constant 0 : index
    %60 = vector.load %arg6[%c1_67, %c0_68] : memref<18x64xf32, #tpu.memory_space<vmem>>, vector<16x64xf32>
    tpu.vector_store %arg6[%c1_67, %c0_68], %59 {strides = array<i32>} : memref<18x64xf32, #tpu.memory_space<vmem>>, vector<16x64xf32>,
    %cst_69 = arith.constant 0.000000e+00 : f32
    %61 = vector.broadcast %cst_69 : f32 to vector<16x64xf32>
    %c0_70 = arith.constant 0 : index
    %c0_71 = arith.constant 0 : index
    %62 = vector.load %arg6[%c0_70, %c0_71] : memref<18x64xf32, #tpu.memory_space<vmem>>, vector<16x64xf32>
    %c2_72 = arith.constant 2 : index
    %c0_73 = arith.constant 0 : index
    %c0_74 = arith.constant 0 : index
    %c0_75 = arith.constant 0 : index
    %63 = vector.load %arg2[%c2_72, %c0_73, %c0_74, %c0_75] : memref<3x3x64x64xf32, #tpu.memory_space<vmem>>, vector<1x1x64x64xf32>
    %64 = vector.shape_cast %63 : vector<1x1x64x64xf32> to vector<64x64xf32>
    %cst_76 = arith.constant dense<0.000000e+00> : vector<16x64xf32>
    %65 = tpu.matmul %62, %64, %cst_76 {dimension_numbers = #tpu.dot_dimension_numbers<[1], [0], [0], [1], [0, 0, 1, 1], [], []>} : vector<16x64xf32>, vector<64x64xf32>, vector<16x64xf32> -> vector<16x64xf32>
    %66 = arith.addf %61, %65 : vector<16x64xf32>
    %c1_77 = arith.constant 1 : index
    %c0_78 = arith.constant 0 : index
    %67 = vector.load %arg6[%c1_77, %c0_78] : memref<18x64xf32, #tpu.memory_space<vmem>>, vector<16x64xf32>
    %c2_79 = arith.constant 2 : index
    %c1_80 = arith.constant 1 : index
    %c0_81 = arith.constant 0 : index
    %c0_82 = arith.constant 0 : index
    %68 = vector.load %arg2[%c2_79, %c1_80, %c0_81, %c0_82] : memref<3x3x64x64xf32, #tpu.memory_space<vmem>>, vector<1x1x64x64xf32>
    %69 = vector.shape_cast %68 : vector<1x1x64x64xf32> to vector<64x64xf32>
    %cst_83 = arith.constant dense<0.000000e+00> : vector<16x64xf32>
    %70 = tpu.matmul %67, %69, %cst_83 {dimension_numbers = #tpu.dot_dimension_numbers<[1], [0], [0], [1], [0, 0, 1, 1], [], []>} : vector<16x64xf32>, vector<64x64xf32>, vector<16x64xf32> -> vector<16x64xf32>
    %71 = arith.addf %66, %70 : vector<16x64xf32>
    %c2_84 = arith.constant 2 : index
    %c0_85 = arith.constant 0 : index
    %72 = vector.load %arg6[%c2_84, %c0_85] : memref<18x64xf32, #tpu.memory_space<vmem>>, vector<16x64xf32>
    %c2_86 = arith.constant 2 : index
    %c2_87 = arith.constant 2 : index
    %c0_88 = arith.constant 0 : index
    %c0_89 = arith.constant 0 : index
    %73 = vector.load %arg2[%c2_86, %c2_87, %c0_88, %c0_89] : memref<3x3x64x64xf32, #tpu.memory_space<vmem>>, vector<1x1x64x64xf32>
    %74 = vector.shape_cast %73 : vector<1x1x64x64xf32> to vector<64x64xf32>
    %cst_90 = arith.constant dense<0.000000e+00> : vector<16x64xf32>
    %75 = tpu.matmul %72, %74, %cst_90 {dimension_numbers = #tpu.dot_dimension_numbers<[1], [0], [0], [1], [0, 0, 1, 1], [], []>} : vector<16x64xf32>, vector<64x64xf32>, vector<16x64xf32> -> vector<16x64xf32>
    %76 = arith.addf %71, %75 : vector<16x64xf32>
    %c2_91 = arith.constant 2 : index
    %c0_92 = arith.constant 0 : index
    %c0_93 = arith.constant 0 : index
    %77 = vector.load %arg3[%c2_91, %c0_92, %c0_93] : memref<3x1x64xf32, #tpu.memory_space<vmem>>, vector<1x1x64xf32>
    %78 = vector.shape_cast %77 : vector<1x1x64xf32> to vector<1x64xf32>
    %79 = vector.broadcast %78 : vector<1x64xf32> to vector<16x64xf32>
    %80 = arith.mulf %76, %79 : vector<16x64xf32>
    %c2_94 = arith.constant 2 : index
    %c0_95 = arith.constant 0 : index
    %c0_96 = arith.constant 0 : index
    %81 = vector.load %arg4[%c2_94, %c0_95, %c0_96] : memref<3x1x64xf32, #tpu.memory_space<vmem>>, vector<1x1x64xf32>
    %82 = vector.shape_cast %81 : vector<1x1x64xf32> to vector<1x64xf32>
    %83 = vector.broadcast %82 : vector<1x64xf32> to vector<16x64xf32>
    %84 = arith.addf %80, %83 : vector<16x64xf32>
    %cst_97 = arith.constant 0.000000e+00 : f32
    %85 = vector.broadcast %cst_97 : f32 to vector<16x64xf32>
    %86 = arith.maximumf %84, %85 : vector<16x64xf32>
    %87 = arith.addf %5, %86 : vector<16x64xf32>
    %cst_98 = arith.constant 0.000000e+00 : f32
    %88 = vector.broadcast %cst_98 : f32 to vector<16x64xf32>
    %89 = arith.maximumf %87, %88 : vector<16x64xf32>
    %c0_99 = arith.constant 0 : index
    %c0_100 = arith.constant 0 : index
    %c0_101 = arith.constant 0 : index
    %90 = vector.load %arg5[%c0_99, %c0_100, %c0_101] : memref<1x16x64xf32, #tpu.memory_space<vmem>>, vector<1x16x64xf32>
    %91 = vector.shape_cast %90 : vector<1x16x64xf32> to vector<16x64xf32>
    %92 = vector.shape_cast %89 : vector<16x64xf32> to vector<1x16x64xf32>
    tpu.vector_store %arg5[%c0_99, %c0_100, %c0_101], %92 {strides = array<i32>} : memref<1x16x64xf32, #tpu.memory_space<vmem>>, vector<1x16x64xf32>,
    return
  }
  func.func @transform_0(%arg0: i32) -> (i32, i32, i32) {
    %c0_i32 = arith.constant 0 : i32
    %c0_i32_0 = arith.constant 0 : i32
    %c0_i32_1 = arith.constant 0 : i32
    return %arg0, %c0_i32, %c0_i32_0 : i32, i32, i32
  }
  func.func @transform_1(%arg0: i32) -> (i32, i32, i32, i32) {
    %c0_i32 = arith.constant 0 : i32
    %c0_i32_0 = arith.constant 0 : i32
    %c0_i32_1 = arith.constant 0 : i32
    %c0_i32_2 = arith.constant 0 : i32
    %c0_i32_3 = arith.constant 0 : i32
    return %c0_i32, %c0_i32_0, %c0_i32_1, %c0_i32_2 : i32, i32, i32, i32
  }
  func.func @transform_2(%arg0: i32) -> (i32, i32, i32) {
    %c0_i32 = arith.constant 0 : i32
    %c0_i32_0 = arith.constant 0 : i32
    %c0_i32_1 = arith.constant 0 : i32
    %c0_i32_2 = arith.constant 0 : i32
    return %c0_i32, %c0_i32_0, %c0_i32_1 : i32, i32, i32
  }
  func.func @transform_3(%arg0: i32) -> (i32, i32, i32) {
    %c0_i32 = arith.constant 0 : i32
    %c0_i32_0 = arith.constant 0 : i32
    %c0_i32_1 = arith.constant 0 : i32
    %c0_i32_2 = arith.constant 0 : i32
    return %c0_i32, %c0_i32_0, %c0_i32_1 : i32, i32, i32
  }
  func.func @transform_4(%arg0: i32) -> (i32, i32, i32) {
    %c0_i32 = arith.constant 0 : i32
    %c0_i32_0 = arith.constant 0 : i32
    %c0_i32_1 = arith.constant 0 : i32
    return %arg0, %c0_i32, %c0_i32_0 : i32, i32, i32
  }
}

</mosaic_0001>

<bundles_post_ra>
// kernel: tpu_custom_call.1
= control target key start
LH: loop header
LB: loop body
LE: loop exit
PB: predicated region body
PF: predicated region fallthrough
CT: control target
= control target key end

     0   :  { %9 = vsyncpa [#allocation5], 0  ;;  %s2202_s0 = inlined_call_operand.hbm [shape: f32[2,16,64], index: 0, kind: input, shape index: {}]   ;;  %s2203_s1 = inlined_call_operand.hbm [shape: f32[3,3,64,64], index: 1, kind: input, shape index: {}]   ;;  %s2204_s2 = inlined_call_operand.vmem [shape: f32[3,1,64], index: 2, kind: input, shape index: {}]   ;;  %s2205_s3 = inlined_call_operand.vmem [shape: f32[3,1,64], index: 3, kind: input, shape index: {}]   ;;  %s2206_s4 = inlined_call_operand.hbm [shape: f32[2,16,64], index: 4, kind: output, shape index: {}]  }
   0x1   :  { %11 = vsyncpa [#allocation5 + $0x1], 0 }
   0x2   :  { %12 = vsyncpa [#allocation8], 0 }
   0x3   :  { %13 = vsyncpa [#allocation6], 0 }
   0x4   :  { %15 = vsyncpa [#allocation6 + $0x1], 0  ;;  %s1935_s15 = smov 0   ;;  %s1937_s16 = smov 0  }
   0x5   :  { %s1939_s17 = smov 0   ;;  %s1941_s18 = smov 0  }
   0x6 LB: > { %s1956_s19 = sadd.s32 4294967295, %s1900_s18   ;;  %s1247_s20 = sadd.s32 4294967294, %s1900_s18   ;;  %s1900_s18 = sphi %s1941_s18, %s2226_s18   ;;  %s1896_s17 = sphi %s1939_s17, %s2225_s17   ;;  %s1892_s16 = sphi %s1937_s16, %s2224_s16   ;;  %s1888_s15 = sphi %s1935_s15, %s2223_s15  }
   0x7   : > { %p41_p0 = scmp.ne.s32.totalorder %s1892_s16, %s1888_s15  ;;  %p2207_p1 = scmp.eq.s32.totalorder %s1956_s19, 0 }
   0x8   : > { %p134_p3 = scmp.eq.s32.totalorder %s1247_s20, 1  ;;  %p1248_p5 = scmp.ge.s32.totalorder %s1900_s18, 1 }
   0x9   : > { %p1965_p4 = por %p2207_p1, %p41_p0  ;;  %p141_p7 = scmp.lt.s32.totalorder %s1900_s18, 3 }
   0xa   : > { %p1970_p6 = por %p134_p3, %p41_p0  ;;  %s1902_s24 = smov [#allocation7]  }
   0xb   : > { %s2210_s21 = scalar_select %p1965_p4, 1, 0 }
   0xc   : > { %s2211_s22 = scalar_select %p1970_p6, 1, 0 }
   0xd   : > { %p1975_p8 = pnand %p1248_p5, %p141_p7  ;;  %s153_s25 = sshll.u32 %s1902_s24, 4  ;;  %s1979_s25 = int_to_ptr.vmem [resolvable:$true] %s153_s25 }
   0xe   : > { %s1991_s27 = sadd.s32 1, %s1900_s18   ;;  %s28_s28 = sadd.s32 1, %s1896_s17 }
   0xf   : > { %s2212_s23 = scalar_select %p1975_p8, 1, 0 }
  0x10   : > { %p1718_p9 = pneg %p1975_p8  ;;  %s25_s29 = ssub.s32 %s1900_s18, %s1991_s27 }
  0x11   : > { %s1772_s6 = scalar_lea.hbm %s2203_s1, 9216 }
  0x12   : > { %p1986_p11 = pnand %p1718_p9, %p2207_p1  ;;  %p1773_p12 = scmp.ne.s32.totalorder %s2203_s1, %s1772_s6 }
  0x13   : > { %p1779_p5 = scmp.lt.u32.totalorder %s1772_s6, %s2203_s1 }
  0x14   : > { %p1774_p13 = pneg %p1986_p11 }
  0x16   : > { %p1775_p0 = pnand %p1774_p13, %p1773_p12 }
  0x18   : > { %p1776_p3 = pneg %p1775_p0 }
  0x1a   : > { %p1781_p7 = pnand %p1779_p5, %p1776_p3 }
  0x1c   : > { %1784 = shalt.err (!%p1781_p7)
}
  0x1d   : > { %s1785_s11 = scalar_lea.vmem %s1979_s25, 9216  ;;  %p1793_p2 = scmp.lt.s32.totalorder %s1979_s25, %s1979_s25 }
  0x1e   : > { %p1786_p9 = scmp.ne.s32.totalorder %s1979_s25, %s1785_s11  ;;  %p1794_p6 = scmp.lt.s32.totalorder %s1785_s11, %s1785_s11 }
  0x20   : > { %p1788_p10 = pnand %p1786_p9, %p1774_p13  ;;  %p1795_p4 = por %p1794_p6, %p1793_p2 }
  0x22   : > { %p1789_p1 = pneg %p1788_p10 }
  0x24   : > { %p1796_p8 = pnand %p1795_p4, %p1789_p1 }
  0x26   : > { %1799 = shalt.err (!%p1796_p8)
}
  0x27   : > { %s1903_s12 = smov 128   ;;  %s1904_s13 = smov 8  }
  0x28   : > { %1721 = dma.hbm_to_vmem [thread:$0]  (!%p1986_p11), %s2203_s1, 9216, %s1979_s25, [#allocation8], %s1903_s12, %s1903_s12, %s1904_s13  }
  0x29   : > { %p26_p1 = scmp.eq.s32.totalorder %s25_s29, 0  ;;  %p35_p2 = scmp.ne.s32.totalorder %s1896_s17, %s1892_s16 }
  0x2a   : > { %p36_p4 = scmp.eq.s32.totalorder %s1900_s18, 0  ;;  %p1731_p6 = scmp.lt.s32.totalorder %s1900_s18, 2 }
  0x2b   : > { %s2025_s24 = scalar_select %p26_p1, %s1896_s17, %s28_s28  }
  0x2c   : > { %p37_p8 = por %p36_p4, %p35_p2  ;;  %p2214_p10 = scmp.eq.s32.totalorder %s1956_s19, 1 }
  0x2d   : > { %s173_s26 = sand.u32 1, %s1896_s17   ;;  %s1291_s5 = sshll.u32 %s1900_s18, 8 }
  0x2e   : > { %p2029_p12 = por %p2214_p10, %p35_p2  ;;  %s1251_s6 = sshll.u32 %s173_s26, 4 }
  0x2f   : > { %s2038_s9 = scalar_lea.hbm %s2202_s0, %s1291_s5  ;;  %s177_s25 = scalar_lea.vmem [#allocation4], %s1251_s6 }
  0x30   : > { %s184_s28 = sshll.u32 %s177_s25, 4  ;;  %p2040_p11 = pnand %p1731_p6, %p37_p8  ;;  %s2044_s28 = int_to_ptr.vmem [resolvable:$true] %s184_s28 }
  0x31   : > { %s2046_s10 = scalar_lea.sflag [#allocation5], %s173_s26  ;;  %s1800_s11 = scalar_lea.hbm %s2038_s9, 256 }
  0x32   : > { %p1801_p13 = scmp.ne.s32.totalorder %s2038_s9, %s1800_s11  ;;  %p1802_p0 = pneg %p2040_p11 }
  0x33   : > { %s1805_s5 = scalar_lea.hbm %s2202_s0, 512  ;;  %p1806_p7 = scmp.lt.u32.totalorder %s2038_s9, %s2202_s0 }
  0x34   : > { %p1803_p3 = pnand %p1802_p0, %p1801_p13  ;;  %p1807_p9 = scmp.lt.u32.totalorder %s1805_s5, %s1800_s11 }
  0x35   : > { %p1809_p2 = scmp.lt.u32.totalorder %s1800_s11, %s2038_s9 }
  0x36   : > { %p1804_p5 = pneg %p1803_p3  ;;  %p1808_p1 = por %p1807_p9, %p1806_p7 }
  0x38   : > { %p1810_p4 = por %p1809_p2, %p1808_p1 }
  0x3a   : > { %p1811_p6 = pnand %p1810_p4, %p1804_p5 }
  0x3c   : > { %1814 = shalt.err (!%p1811_p6)
}
  0x3d   : > { %s1815_s26 = scalar_lea.vmem %s2044_s28, 256  ;;  %s1905_s8 = smov [#allocation4]  }
  0x3e   : > { %p1816_p8 = scmp.ne.s32.totalorder %s2044_s28, %s1815_s26  ;;  %s1820_s25 = sshll.u32 %s1905_s8, 4  ;;  %s1821_s25 = int_to_ptr.vmem [resolvable:$false] %s1820_s25 }
  0x3f   : > { %s1822_s14 = scalar_lea.vmem %s1821_s25, 512  ;;  %p1823_p3 = scmp.lt.s32.totalorder %s2044_s28, %s1821_s25 }
  0x40   : > { %p1818_p10 = pnand %p1816_p8, %p1802_p0  ;;  %p1824_p7 = scmp.lt.s32.totalorder %s1822_s14, %s1815_s26 }
  0x42   : > { %p1819_p13 = pneg %p1818_p10  ;;  %p1825_p9 = por %p1824_p7, %p1823_p3 }
  0x44   : > { %p1826_p1 = pnand %p1825_p9, %p1819_p13 }
  0x46   : > { %1829 = shalt.err (!%p1826_p1)
}
  0x47   : > { %1725 = dma.hbm_to_vmem [thread:$0]  (!%p2040_p11), %s2038_s9, 256, %s2044_s28, %s2046_s10, %s1903_s12, %s1903_s12, %s1904_s13  }
  0x48   : > { %p2217_p0 = scmp.ne.s32.totalorder %s2212_s23, 0 }
  0x49   : > { %s2080_s11 = sand.u32 (!%p2217_p0), 1, %s1892_s16   ;;  %p2218_p5 = scmp.ne.s32.totalorder (!%p2217_p0), %s2210_s21, 0 }
  0x4a   : > { %196 = sbr.rel (%p2217_p0) target bundleno = 880 (0x370), region = 36  ;;  %s1255_s20 = sshll.u32 (!%p2217_p0), %s2080_s11, 4 }
  0x4b   : > { %s199_s5 = scalar_lea.sflag (!%p2217_p0), [#allocation5], %s2080_s11  ;;  %s202_s29 = scalar_lea.vmem (!%p2217_p0), [#allocation4], %s1255_s20 }
  0x51   : > { %1875 = dma.done.wait (%p2218_p5), %s199_s5, 256  }
  0x52   : > { %1877 = vsyncadd (%p2218_p5), %s199_s5, 4294967040  ;;  %p2219_p11 = scmp.eq.s32.totalorder %s1956_s19, 0 }
  0x54   : > { %1879 = dma.done.wait (%p2219_p11), [#allocation8], 9216   ;;  %p2220_p2 = pmov %p2219_p11 }
  0x55   : > { %vm231_vm0 = vcmask 523264   ;;  %vm234_vm1 = vcmask 517120   ;;  %v1906_v0 = vmov 0.0   ;;  %v245_v1 = vld [vmem:[#allocation7] sm:$0xff]  ;;  %v246_v2 = vld [vmem:[#allocation7 + $0x8] sm:$0xff]  ;;  %v247_v3 = vld [vmem:[#allocation7 + $0x10] sm:$0xff] }
  0x56   : > { %1881 = vsyncadd (%p2220_p2), [#allocation8], 4294958080  ;;  %232 = vst.msk [vmem:[#allocation2] sm:$0xff] %vm231_vm0, %v1906_v0  ;;  %v1570_v4 = vpack.c.bf16 %v246_v2, %v245_v1  ;;  %v248_v5 = vld [vmem:[#allocation7 + $0x18] sm:$0xff]  ;;  %v249_v7 = vld [vmem:[#allocation7 + $0x20] sm:$0xff]  ;;  %s1292_s14 = sshll.u32 %s1956_s19, 8 }
  0x57   : > { %233 = vst.msk [vmem:[#allocation2 + $0x8] sm:$0xff] %vm231_vm0, %v1906_v0  ;;  %236 = vst.msk [vmem:[#allocation3] sm:$0xff] %vm231_vm0, %v1906_v0  ;;  %v1574_v6 = vpack.c.bf16 %v248_v5, %v247_v3  ;;  %v250_v8 = vld [vmem:[#allocation7 + $0x28] sm:$0xff]  ;;  %v256_v9 = vld [vmem:[#allocation7 + $0x40] sm:$0xff]  ;;  %s230_s5 = scalar_lea.vmem [#allocation9], %s1255_s20  ;;  %s2154_s12 = scalar_lea.hbm %s2206_s4, %s1292_s14 }
  0x58   : > { %237 = vst.msk [vmem:[#allocation3 + $0x8] sm:$0xff] %vm231_vm0, %v1906_v0  ;;  %1571 = vmatprep.subr.bf16.mxu0 %v1570_v4  ;;  %v257_v10 = vld [vmem:[#allocation7 + $0x48] sm:$0xff]  ;;  %v2098_v11 = vld [vmem:[%s202_s29] sm:$0xff]  ;;  %v1578_v15 = vpack.c.bf16 %v250_v8, %v249_v7  ;;  %v259_v17 = vld [vmem:[#allocation7 + $0x58] sm:$0xff]  ;;  %s1151_s19 = scalar_lea.sflag [#allocation6], %s2080_s11  ;;  %s1907_s13 = smov [#allocation9]  }
  0x59   : > { %235 = vst.msk [vmem:[#allocation2 + $0x10] sm:$0x3] %vm234_vm1, %v1906_v0  ;;  %238 = vst.msk [vmem:[#allocation3 + $0x10] sm:$0x3] %vm234_vm1, %v1906_v0  ;;  %1573 = vmatpush3.bf16.msra.mxu0 %v1570_v4  ;;  %v1554_v12 = vpack.c.bf16 %v257_v10, %v256_v9  ;;  %v2102_v13 = vld [vmem:[%s202_s29 + $0x8] sm:$0xff]  ;;  %v258_v14 = vld [vmem:[#allocation7 + $0x50] sm:$0xff] }
  0x5a   : > { %241 = vst.msk [vmem:[#allocation2 + $0x1] sm:$0xff] %vm231_vm0, %v2098_v11  ;;  %1575 = vmatprep.subr.bf16.mxu0 %v1574_v6  ;;  %v251_v16 = vld [vmem:[#allocation7 + $0x30] sm:$0xff]  ;;  %242 = vst.msk [vmem:[#allocation2 + $0x9] sm:$0xff] %vm231_vm0, %v2102_v13  ;;  %v252_v18 = vld [vmem:[#allocation7 + $0x38] sm:$0xff]  ;;  %v1558_v19 = vpack.c.bf16 %v259_v17, %v258_v14  ;;  %s1164_s29 = sshll.u32 %s230_s5, 4  ;;  %s1834_s9 = sshll.u32 %s1907_s13, 4  ;;  %s2156_s29 = int_to_ptr.vmem [resolvable:$true] %s1164_s29  ;;  %s1835_s9 = int_to_ptr.vmem [resolvable:$false] %s1834_s9 }
  0x5b   : > { %1555 = vmatprep.subr.bf16.mxu1 %v1554_v12  ;;  %v260_v20 = vld [vmem:[#allocation7 + $0x60] sm:$0xff]  ;;  %v261_v21 = vld [vmem:[#allocation7 + $0x68] sm:$0xff]  ;;  %v1582_v22 = vpack.c.bf16 %v252_v18, %v251_v16  ;;  %v262_v24 = vld [vmem:[#allocation7 + $0x70] sm:$0xff]  ;;  %s1830_s20 = scalar_lea.vmem %s2156_s29, 256  ;;  %s1836_s28 = scalar_lea.vmem %s1835_s9, 512 }
  0x5c   : > { %1557 = vmatpush3.bf16.msra.mxu1 %v1554_v12  ;;  %v1562_v23 = vpack.c.bf16 %v261_v21, %v260_v20  ;;  %v263_v25 = vld [vmem:[#allocation7 + $0x78] sm:$0xff]  ;;  %v429_v26 = vld [vmem:[#allocation7 + $0x80] sm:$0xff]  ;;  %v430_v27 = vld [vmem:[#allocation7 + $0x88] sm:$0xff]  ;;  %p1831_p4 = scmp.ne.s32.totalorder %s2156_s29, %s1830_s20  ;;  %p1837_p10 = scmp.lt.s32.totalorder %s2156_s29, %s1835_s9 }
  0x5d   : > { %1577 = vmatpush3.bf16.msra.mxu0 %v1574_v6  ;;  %1559 = vmatprep.subr.bf16.mxu1 %v1558_v19  ;;  %v1566_v30 = vpack.c.bf16 %v263_v25, %v262_v24  ;;  %v1586_v31 = vpack.c.bf16 %v430_v27, %v429_v26  ;;  %v431_v32 = vld [vmem:[#allocation7 + $0x90] sm:$0xff]  ;;  %v432_v33 = vld [vmem:[#allocation7 + $0x98] sm:$0xff]  ;;  %v433_v37 = vld [vmem:[#allocation7 + $0xa0] sm:$0xff]  ;;  %p1838_p13 = scmp.lt.s32.totalorder %s1836_s28, %s1830_s20 }
  0x5e   : > { %1579 = vmatprep.subr.bf16.mxu0 %v1578_v15  ;;  %v1590_v35 = vpack.c.bf16 %v432_v33, %v431_v32  ;;  %v434_v38 = vld [vmem:[#allocation7 + $0xa8] sm:$0xff]  ;;  %v435_v41 = vld [vmem:[#allocation7 + $0xb0] sm:$0xff]  ;;  %v436_v42 = vld [vmem:[#allocation7 + $0xb8] sm:$0xff]  ;;  %p1832_p6 = pnand %p1831_p4, %p2029_p12 }
  0x5f   : > { %v1594_v40 = vpack.c.bf16 %v434_v38, %v433_v37  ;;  %v1598_v43 = vpack.c.bf16 %v436_v42, %v435_v41  ;;  %v556_v45 = vld [vmem:[#allocation7 + $0x100] sm:$0xff]  ;;  %v557_v46 = vld [vmem:[#allocation7 + $0x108] sm:$0xff]  ;;  %v558_v48 = vld [vmem:[#allocation7 + $0x110] sm:$0xff]  ;;  %p1839_p3 = por %p1838_p13, %p1837_p10 }
  0x60   : > { %1561 = vmatpush3.bf16.msra.mxu1 %v1558_v19  ;;  %v1602_v47 = vpack.c.bf16 %v557_v46, %v556_v45  ;;  %v559_v49 = vld [vmem:[#allocation7 + $0x118] sm:$0xff]  ;;  %v560_v51 = vld [vmem:[#allocation7 + $0x120] sm:$0xff]  ;;  %v561_v52 = vld [vmem:[#allocation7 + $0x128] sm:$0xff]  ;;  %p1833_p8 = pneg %p1832_p6 }
  0x61   : > { %v243_v28 = vld [vmem:[#allocation2] sm:$0xff]  ;;  %1581 = vmatpush3.bf16.msra.mxu0 %v1578_v15  ;;  %1563 = vmatprep.subr.bf16.mxu1 %v1562_v23  ;;  %v244_v34 = vld [vmem:[#allocation2 + $0x8] sm:$0xff]  ;;  %v1606_v50 = vpack.c.bf16 %v559_v49, %v558_v48  ;;  %v1610_v53 = vpack.c.bf16 %v561_v52, %v560_v51  ;;  %v545_v57 = vld [vmem:[#allocation7 + $0xc0] sm:$0xff] }
  0x62   : > { %v253_v29 = vld [vmem:[#allocation2 + $0x1] sm:$0xff]  ;;  %1418 = vmatprep.mubr.msk.f32.mxu0 %vm231_vm0, %v243_v28  ;;  %1583 = vmatprep.subr.bf16.mxu0 %v1582_v22  ;;  %v254_v39 = vld [vmem:[#allocation2 + $0x9] sm:$0xff]  ;;  %v546_v58 = vld [vmem:[#allocation7 + $0xc8] sm:$0xff]  ;;  %p1840_p7 = pnand %p1839_p3, %p1833_p8 }
  0x63   : > { %1399 = vmatprep.mubr.msk.f32.mxu1 %vm231_vm0, %v253_v29  ;;  %v426_v36 = vld [vmem:[#allocation2 + $0x2] sm:$0xff]  ;;  %v427_v44 = vld [vmem:[#allocation2 + $0xa] sm:$0xff]  ;;  %v1618_v59 = vpack.c.bf16 %v546_v58, %v545_v57  ;;  %v1264_v63 = vld [vmem:[%s2204_s2] ss:$0 sm:$0xff] }
  0x64   : > { %1565 = vmatpush3.bf16.msra.mxu1 %v1562_v23  ;;  %v562_v54 = vld [vmem:[#allocation7 + $0x130] sm:$0xff]  ;;  %v563_v55 = vld [vmem:[#allocation7 + $0x138] sm:$0xff]  ;;  %v549_v17 = vld [vmem:[#allocation7 + $0xe0] sm:$0xff] }
  0x65   : > { %1585 = vmatpush3.bf16.msra.mxu0 %v1582_v22  ;;  %1567 = vmatprep.subr.bf16.mxu1 %v1566_v30  ;;  %v1614_v56 = vpack.c.bf16 %v563_v55, %v562_v54  ;;  %v1265_v2 = vld [vmem:[%s2205_s3] ss:$0 sm:$0xff]  ;;  %v548_v12 = vld [vmem:[#allocation7 + $0xd8] sm:$0xff]  ;;  %v550_v18 = vld [vmem:[#allocation7 + $0xe8] sm:$0xff] }
  0x66   : > { %1587 = vmatprep.subr.bf16.mxu0 %v1586_v31  ;;  %v547_v10 = vld [vmem:[#allocation7 + $0xd0] sm:$0xff]  ;;  %v1626_v20 = vpack.c.bf16 %v550_v18, %v549_v17  ;;  %v552_v22 = vld [vmem:[#allocation7 + $0xf8] sm:$0xff]  ;;  %v729_v24 = vld [vmem:[#allocation7 + $0x140] sm:$0xff] }
  0x67   : > { %v1622_v15 = vpack.c.bf16 %v548_v12, %v547_v10  ;;  %v551_v21 = vld [vmem:[#allocation7 + $0xf0] sm:$0xff]  ;;  %v730_v25 = vld [vmem:[#allocation7 + $0x148] sm:$0xff]  ;;  %v732_v28 = vld [vmem:[#allocation7 + $0x158] sm:$0xff] }
  0x68   : > { %1419 = vmatmul.mubr.msk.f32.vlgmr.msra.gmra.mrb[0].mxu0 %vm231_vm0, %v244_v34  ;;  %1569 = vmatpush3.bf16.msra.mxu1 %v1566_v30  ;;  %v1630_v23 = vpack.c.bf16 %v552_v22, %v551_v21  ;;  %v1634_v26 = vpack.c.bf16 %v730_v25, %v729_v24  ;;  %v731_v27 = vld [vmem:[#allocation7 + $0x150] sm:$0xff]  ;;  %v734_v32 = vld [vmem:[#allocation7 + $0x168] sm:$0xff]  ;;  %v862_v45 = vld [vmem:[#allocation7 + $0x1e0] sm:$0xff] }
  0x69   : > { %1589 = vmatpush3.bf16.msra.mxu0 %v1586_v31  ;;  %1437 = vmatprep.mubr.msk.f32.mxu0 %vm231_vm0, %v426_v36  ;;  %v1638_v29 = vpack.c.bf16 %v732_v28, %v731_v27  ;;  %v733_v31 = vld [vmem:[#allocation7 + $0x160] sm:$0xff]  ;;  %v736_v36 = vld [vmem:[#allocation7 + $0x178] sm:$0xff]  ;;  %v860_v42 = vld [vmem:[#allocation7 + $0x1d0] sm:$0xff] }
  0x6a   : > { %1591 = vmatprep.subr.bf16.mxu0 %v1590_v35  ;;  %1603 = vmatprep.subr.bf16.mxu1 %v1602_v47  ;;  %v1642_v34 = vpack.c.bf16 %v734_v32, %v733_v31  ;;  %v863_v46 = vld [vmem:[#allocation7 + $0x1e8] sm:$0xff]  ;;  %v864_v48 = vld [vmem:[#allocation7 + $0x1f0] sm:$0xff]  ;;  %v865_v49 = vld [vmem:[#allocation7 + $0x1f8] sm:$0xff] }
  0x6b   : > { %1400 = vmatmul.mubr.msk.f32.vlgmr.msra.gmra.mrb[0].mxu1 %vm231_vm0, %v254_v39  ;;  %v858_v39 = vld [vmem:[#allocation7 + $0x1c0] sm:$0xff]  ;;  %v848_v52 = vld [vmem:[#allocation7 + $0x188] sm:$0xff]  ;;  %v1273_v54 = vld [vmem:[%s2204_s2 + $0x1] ss:$0 sm:$0xff] }
  0x6c   : > { %1605 = vmatpush3.bf16.msra.mxu1 %v1602_v47  ;;  %v1658_v47 = vpack.c.bf16 %v863_v46, %v862_v45  ;;  %v847_v51 = vld [vmem:[#allocation7 + $0x180] sm:$0xff]  ;;  %v854_v10 = vld [vmem:[#allocation7 + $0x1b8] sm:$0xff]  ;;  %v1033_v17 = vld [vmem:[#allocation7 + $0x210] sm:$0xff] }
  0x6d   : > { %1593 = vmatpush3.bf16.msra.mxu0 %v1590_v35  ;;  %1607 = vmatprep.subr.bf16.mxu1 %v1606_v50  ;;  %v735_v35 = vld [vmem:[#allocation7 + $0x170] sm:$0xff]  ;;  %v1034_v18 = vld [vmem:[#allocation7 + $0x218] sm:$0xff]  ;;  %v1035_v21 = vld [vmem:[#allocation7 + $0x220] sm:$0xff] }
  0x6e   : > { %1595 = vmatprep.subr.bf16.mxu0 %v1594_v40  ;;  %v1646_v37 = vpack.c.bf16 %v736_v36, %v735_v35  ;;  %v1036_v22 = vld [vmem:[#allocation7 + $0x228] sm:$0xff]  ;;  %v1037_v25 = vld [vmem:[#allocation7 + $0x230] sm:$0xff] }
  0x6f   : > { %v1690_v24 = vpack.c.bf16 %v1036_v22, %v1035_v21  ;;  %v1285_v31 = vld [vmem:[%s2205_s3 + $0x2] ss:$0 sm:$0xff] }
  0x70   : > { %1609 = vmatpush3.bf16.msra.mxu1 %v1606_v50  ;;  %v1662_v50 = vpack.c.bf16 %v865_v49, %v864_v48 }
  0x71   : > { %1597 = vmatpush3.bf16.msra.mxu0 %v1594_v40  ;;  %1611 = vmatprep.subr.bf16.mxu1 %v1610_v53  ;;  %v859_v40 = vld [vmem:[#allocation7 + $0x1c8] sm:$0xff] }
  0x72   : > { %1599 = vmatprep.subr.bf16.mxu0 %v1598_v43  ;;  %v1650_v41 = vpack.c.bf16 %v859_v40, %v858_v39 }
  0x74   : > { %1613 = vmatpush3.bf16.msra.mxu1 %v1610_v53  ;;  %v1666_v53 = vpack.c.bf16 %v848_v52, %v847_v51 }
  0x75   : > { %1601 = vmatpush3.bf16.msra.mxu0 %v1598_v43  ;;  %1615 = vmatprep.subr.bf16.mxu1 %v1614_v56  ;;  %v861_v43 = vld [vmem:[#allocation7 + $0x1d8] sm:$0xff] }
  0x76   : > { %1651 = vmatprep.subr.bf16.mxu0 %v1650_v41 }
  0x78   : > { %1438 = vmatmul.mubr.msk.f32.vlgmr.msra.gmra.mrb[0].mxu0 %vm231_vm0, %v427_v44  ;;  %1617 = vmatpush3.bf16.msra.mxu1 %v1614_v56  ;;  %v1654_v44 = vpack.c.bf16 %v861_v43, %v860_v42  ;;  %v1275_v56 = vld [vmem:[%s2205_s3 + $0x1] ss:$0 sm:$0xff] }
  0x79   : > { %1619 = vmatprep.subr.bf16.mxu1 %v1618_v59  ;;  %1653 = vmatpush3.bf16.msra.mxu0 %v1650_v41 }
  0x7a   : > { %1655 = vmatprep.subr.bf16.mxu0 %v1654_v44 }
  0x7d   : > { %1657 = vmatpush3.bf16.msra.mxu0 %v1654_v44 }
  0x7e   : > { %1659 = vmatprep.subr.bf16.mxu0 %v1658_v47 }
  0x81   : > { %1661 = vmatpush3.bf16.msra.mxu0 %v1658_v47 }
  0x82   : > { %1663 = vmatprep.subr.bf16.mxu0 %v1662_v50 }
  0x85   : > { %1665 = vmatpush3.bf16.msra.mxu0 %v1662_v50 }
  0x86   : > { %1667 = vmatprep.subr.bf16.mxu0 %v1666_v53 }
 0x13e   : > { %v1401_v60 = vpop.f32.mrb[0].mxu1 }
 0x13f   : > { %v336_v61 = vpop.f32.mrb[1].mxu1 }
 0x14b   : > { %v1439_v62 = vpop.f32.mrb[0].mxu0 }
 0x14c   : > { %v1698_v0 = vadd.f32 %v1439_v62, %v1401_v60  ;;  %v509_v1 = vpop.f32.mrb[1].mxu0 }
 0x14d   : > { %v1699_v3 = vadd.f32 %v509_v1, %v336_v61  ;;  %v850_v1 = vld [vmem:[#allocation7 + $0x198] sm:$0xff] }
 0x14e   : > { %v528_v4 = vmul.f32 %v1698_v0, %v1264_v63  ;;  %v849_v0 = vld [vmem:[#allocation7 + $0x190] sm:$0xff] }
 0x14f   : > { %v527_v5 = vmul.f32 %v1699_v3, %v1264_v63  ;;  %v1670_v3 = vpack.c.bf16 %v850_v1, %v849_v0 }
 0x150   : > { %v537_v6 = vadd.f32 %v1265_v2, %v528_v4 }
 0x151   : > { %v536_v7 = vadd.f32 %v1265_v2, %v527_v5  ;;  %v851_v5 = vld [vmem:[#allocation7 + $0x1a0] sm:$0xff] }
 0x152   : > { %v539_v8 = vmax.f32 %v537_v6, 0.0  ;;  %v852_v6 = vld [vmem:[#allocation7 + $0x1a8] sm:$0xff] }
 0x153   : > { %v538_v9 = vmax.f32 %v536_v7, 0.0 }
 0x154   : > { %541 = vst.msk [vmem:[#allocation3 + $0x9] sm:$0xff] %vm231_vm0, %v539_v8  ;;  %v1674_v8 = vpack.c.bf16 %v852_v6, %v851_v5 }
 0x155   : > { %540 = vst.msk [vmem:[#allocation3 + $0x1] sm:$0xff] %vm231_vm0, %v538_v9  ;;  %v853_v9 = vld [vmem:[#allocation7 + $0x1b0] sm:$0xff] }
 0x156   : > { %v1678_v12 = vpack.c.bf16 %v854_v10, %v853_v9 }
 0x15b   : > { %v554_v16 = vld [vmem:[#allocation3 + $0x9] sm:$0xff] }
 0x15c   : > { %v553_v14 = vld [vmem:[#allocation3 + $0x1] sm:$0xff]  ;;  %v727_v38 = vld [vmem:[#allocation3 + $0xa] sm:$0xff] }
 0x15d   : > { %1456 = vmatprep.mubr.msk.f32.mxu1 %vm231_vm0, %v553_v14  ;;  %v542_v19 = vld [vmem:[#allocation3] sm:$0xff]  ;;  %v543_v30 = vld [vmem:[#allocation3 + $0x8] sm:$0xff]  ;;  %v1031_v14 = vld [vmem:[#allocation7 + $0x200] sm:$0xff] }
 0x15e   : > { %1457 = vmatmul.mubr.msk.f32.vlgmr.msra.gmra.mrb[2].mxu1 %vm231_vm0, %v554_v16  ;;  %v726_v33 = vld [vmem:[#allocation3 + $0x2] sm:$0xff] }
 0x15f   : > { %1621 = vmatpush3.bf16.msra.mxu1 %v1618_v59  ;;  %1475 = vmatprep.mubr.msk.f32.mxu1 %vm231_vm0, %v542_v19  ;;  %v1686_v19 = vpack.c.bf16 %v1034_v18, %v1033_v17 }
 0x160   : > { %1623 = vmatprep.subr.bf16.mxu1 %v1622_v15 }
 0x163   : > { %1625 = vmatpush3.bf16.msra.mxu1 %v1622_v15  ;;  %v1032_v15 = vld [vmem:[#allocation7 + $0x208] sm:$0xff] }
 0x164   : > { %1627 = vmatprep.subr.bf16.mxu1 %v1626_v20  ;;  %v1682_v16 = vpack.c.bf16 %v1032_v15, %v1031_v14 }
 0x167   : > { %1629 = vmatpush3.bf16.msra.mxu1 %v1626_v20 }
 0x168   : > { %1631 = vmatprep.subr.bf16.mxu1 %v1630_v23 }
 0x16b   : > { %1633 = vmatpush3.bf16.msra.mxu1 %v1630_v23 }
 0x16c   : > { %1635 = vmatprep.subr.bf16.mxu1 %v1634_v26 }
 0x16e   : > { %1476 = vmatmul.mubr.msk.f32.vlgmr.msra.gmra.mrb[2].mxu1 %vm231_vm0, %v543_v30 }
 0x16f   : > { %1637 = vmatpush3.bf16.msra.mxu1 %v1634_v26  ;;  %1494 = vmatprep.mubr.msk.f32.mxu1 %vm231_vm0, %v726_v33  ;;  %v1038_v26 = vld [vmem:[#allocation7 + $0x238] sm:$0xff] }
 0x170   : > { %1639 = vmatprep.subr.bf16.mxu1 %v1638_v29  ;;  %v1694_v27 = vpack.c.bf16 %v1038_v26, %v1037_v25 }
 0x173   : > { %1641 = vmatpush3.bf16.msra.mxu1 %v1638_v29  ;;  %v1283_v29 = vld [vmem:[%s2204_s2 + $0x2] ss:$0 sm:$0xff] }
 0x174   : > { %1643 = vmatprep.subr.bf16.mxu1 %v1642_v34 }
 0x177   : > { %1645 = vmatpush3.bf16.msra.mxu1 %v1642_v34 }
 0x178   : > { %1647 = vmatprep.subr.bf16.mxu1 %v1646_v37 }
 0x17b   : > { %1649 = vmatpush3.bf16.msra.mxu1 %v1646_v37 }
 0x17e   : > { %1495 = vmatmul.mubr.msk.f32.vlgmr.msra.gmra.mrb[2].mxu1 %vm231_vm0, %v727_v38 }
 0x251   : > { %v1496_v55 = vpop.f32.mrb[2].mxu1 }
 0x252   : > { %v829_v57 = vmul.f32 %v1496_v55, %v1273_v54  ;;  %v809_v58 = vpop.f32.mrb[3].mxu1 }
 0x253   : > { %v828_v59 = vmul.f32 %v1273_v54, %v809_v58 }
 0x254   : > { %v839_v60 = vadd.f32 %v1275_v56, %v829_v57 }
 0x255   : > { %v838_v61 = vadd.f32 %v1275_v56, %v828_v59 }
 0x256   : > { %v841_v62 = vmax.f32 %v839_v60, 0.0 }
 0x257   : > { %v840_v63 = vmax.f32 %v838_v61, 0.0 }
 0x258   : > { %843 = vst.msk [vmem:[#allocation2 + $0x9] sm:$0xff] %vm231_vm0, %v841_v62 }
 0x259   : > { %842 = vst.msk [vmem:[#allocation2 + $0x1] sm:$0xff] %vm231_vm0, %v840_v63 }
 0x25f   : > { %v856_v4 = vld [vmem:[#allocation2 + $0x9] sm:$0xff] }
 0x260   : > { %v855_v2 = vld [vmem:[#allocation2 + $0x1] sm:$0xff]  ;;  %v1029_v28 = vld [vmem:[#allocation2 + $0xa] sm:$0xff] }
 0x261   : > { %1513 = vmatprep.mubr.msk.f32.mxu0 %vm231_vm0, %v855_v2  ;;  %v844_v7 = vld [vmem:[#allocation2] sm:$0xff]  ;;  %v845_v20 = vld [vmem:[#allocation2 + $0x8] sm:$0xff] }
 0x262   : > { %1514 = vmatmul.mubr.msk.f32.vlgmr.msra.gmra.mrb[2].mxu0 %vm231_vm0, %v856_v4  ;;  %v1028_v23 = vld [vmem:[#allocation2 + $0x2] sm:$0xff] }
 0x263   : > { %1669 = vmatpush3.bf16.msra.mxu0 %v1666_v53  ;;  %1532 = vmatprep.mubr.msk.f32.mxu0 %vm231_vm0, %v844_v7 }
 0x264   : > { %1671 = vmatprep.subr.bf16.mxu0 %v1670_v3 }
 0x267   : > { %1673 = vmatpush3.bf16.msra.mxu0 %v1670_v3 }
 0x268   : > { %1675 = vmatprep.subr.bf16.mxu0 %v1674_v8 }
 0x26b   : > { %1677 = vmatpush3.bf16.msra.mxu0 %v1674_v8 }
 0x26c   : > { %1679 = vmatprep.subr.bf16.mxu0 %v1678_v12 }
 0x26f   : > { %1681 = vmatpush3.bf16.msra.mxu0 %v1678_v12 }
 0x270   : > { %1683 = vmatprep.subr.bf16.mxu0 %v1682_v16 }
 0x272   : > { %1533 = vmatmul.mubr.msk.f32.vlgmr.msra.gmra.mrb[2].mxu0 %vm231_vm0, %v845_v20 }
 0x273   : > { %1685 = vmatpush3.bf16.msra.mxu0 %v1682_v16  ;;  %1551 = vmatprep.mubr.msk.f32.mxu0 %vm231_vm0, %v1028_v23 }
 0x274   : > { %1687 = vmatprep.subr.bf16.mxu0 %v1686_v19 }
 0x277   : > { %1689 = vmatpush3.bf16.msra.mxu0 %v1686_v19 }
 0x278   : > { %1691 = vmatprep.subr.bf16.mxu0 %v1690_v24 }
 0x27b   : > { %1693 = vmatpush3.bf16.msra.mxu0 %v1690_v24 }
 0x27c   : > { %1695 = vmatprep.subr.bf16.mxu0 %v1694_v27 }
 0x27f   : > { %1697 = vmatpush3.bf16.msra.mxu0 %v1694_v27 }
 0x282   : > { %1552 = vmatmul.mubr.msk.f32.vlgmr.msra.gmra.mrb[2].mxu0 %vm231_vm0, %v1029_v28 }
 0x355   : > { %v1553_v30 = vpop.f32.mrb[2].mxu0 }
 0x356   : > { %v1131_v32 = vmul.f32 %v1553_v30, %v1283_v29  ;;  %v1111_v33 = vpop.f32.mrb[3].mxu0 }
 0x357   : > { %v1130_v34 = vmul.f32 %v1283_v29, %v1111_v33 }
 0x358   : > { %v1141_v35 = vadd.f32 %v1285_v31, %v1131_v32 }
 0x359   : > { %v1140_v36 = vadd.f32 %v1285_v31, %v1130_v34 }
 0x35a   : > { %v1143_v37 = vmax.f32 %v1141_v35, 0.0 }
 0x35b   : > { %v1142_v38 = vmax.f32 %v1140_v36, 0.0 }
 0x35c   : > { %v1145_v39 = vadd.f32 %v1143_v37, %v2102_v13 }
 0x35d   : > { %v1144_v40 = vadd.f32 %v1142_v38, %v2098_v11 }
 0x35e   : > { %v1147_v41 = vmax.f32 %v1145_v39, 0.0 }
 0x35f   : > { %v1146_v42 = vmax.f32 %v1144_v40, 0.0 }
 0x360   : > { %1149 = vst.msk [vmem:[%s230_s5 + $0x8] sm:$0xff] %vm231_vm0, %v1147_v41 }
 0x361   : > { %1148 = vst.msk [vmem:[%s230_s5] sm:$0xff] %vm231_vm0, %v1146_v42 }
 0x362   : > { %1843 = shalt.err (!%p1840_p7)
}
 0x363   : > { %s1844_s10 = scalar_lea.hbm %s2154_s12, 256  ;;  %s1848_s26 = scalar_lea.hbm %s2206_s4, 512 }
 0x364   : > { %p1845_p9 = scmp.ne.s32.totalorder %s2154_s12, %s1844_s10  ;;  %p1849_p5 = scmp.lt.u32.totalorder %s2154_s12, %s2206_s4 }
 0x365   : > { %p1850_p11 = scmp.lt.u32.totalorder %s1848_s26, %s1844_s10  ;;  %p1852_p4 = scmp.lt.u32.totalorder %s1844_s10, %s2154_s12 }
 0x366   : > { %p1846_p1 = pnand %p1845_p9, %p2029_p12 }
 0x367   : > { %p1851_p2 = por %p1850_p11, %p1849_p5 }
 0x368   : > { %p1847_p0 = pneg %p1846_p1 }
 0x369   : > { %p1853_p6 = por %p1852_p4, %p1851_p2 }
 0x36b   : > { %p1854_p8 = pnand %p1853_p6, %p1847_p0 }
 0x36d   : > { %1857 = shalt.err (!%p1854_p8)
}
 0x36e   : > { %s1908_s14 = smov 128   ;;  %s1909_s5 = smov 8  }
 0x36f   : > { %1716 = dma.vmem_to_hbm [thread:$0]  (%p2029_p12), %s2156_s29, 256, %s2154_s12, %s1151_s19, %s1908_s14, %s1908_s14, %s1909_s5  }
 0x370 PF: > { %s1179_s21 = sand.u32 1, %s1888_s15   ;;  %p2221_p10 = scmp.ne.s32.totalorder %s2211_s22, 0 }
 0x371   : > { %p2222_p13 = scmp.ge.s32.totalorder %s1900_s18, 2  ;;  %s1180_s23 = scalar_lea.sflag [#allocation6], %s1179_s21 }
 0x373   : > { %p1727_p3 = pnand %p2222_p13, %p2221_p10 }
 0x375   : > { %1883 = dma.done.wait (!%p1727_p3), %s1180_s23, 256  }
 0x376   : > { %1885 = vsyncadd (!%p1727_p3), %s1180_s23, 4294967040  ;;  %p18_p7 = scmp.ge.s32.totalorder %s1991_s27, 4   ;;  %s2223_s15 = smov %s1892_s16 }
 0x377   : > { %s2224_s16 = smov %s1896_s17  ;;  %s2225_s17 = smov %s2025_s24 }
 0x378   : > { %s2226_s18 = smov %s1991_s27  ;;  %20 = sbr.rel (!%p18_p7) target bundleno = 6 (0x6), region = 97 }
 0x37f   :  { %1185 = vsyncpa [#allocation5], 1 }
 0x380   :  { %1187 = vsyncpa [#allocation5 + $0x1], 1 }
 0x381   :  { %1188 = vsyncpa [#allocation8], 1 }
 0x382   :  { %1189 = vsyncpa [#allocation6], 1 }
 0x383   :  { %1191 = vsyncpa [#allocation6 + $0x1], 1 }

</bundles_post_ra>
